<compile_context>
chip_gen: v7x
topology: tpu7x:2x2x1
jax: 0.10.0
libtpu: 0.0.40
codegen_flags: <defaults>
</compile_context>

<pallas_src>
import functools

import numpy as np

import jax
import jax.numpy as jnp
from jax import lax
from jax.experimental import pallas as pl
from jax.experimental.pallas import tpu as pltpu

BN_EPS = 1e-5


def _down_kernel(pooled_ref, w1_ref, g1_ref, b1_ref, w2_ref, g2_ref, b2_ref,
                 mask_ref, o_ref, col1_ref, col2_ref, *, wp):
    # pooled_ref : (Cin, R)      channels-first, flat pixel axis on lanes
    # w1_ref     : (Cmid, 9*Cin) conv1 weights, K flattened as (ky, kx, ci)
    # w2_ref     : (Cout, 9*Cmid)conv2 weights, K flattened as (ky, kx, cm)
    # g*/b*      : (C, 1)        BN affine params (column vectors)
    # mask_ref   : (9, R) f32    tap-validity mask, tap-major, shared by both convs
    # o_ref      : (Cout, R)     channels-first flat output (dense lane store)
    # scratch    : col1 (9*Cin, R), col2 (9*Cmid, R)  -- tap-major im2col slabs
    cin, r = pooled_ref.shape
    cmid = w1_ref.shape[0]
    inv_r = 1.0 / r

    def im2col(src, dst_ref, c):
        # Tap (ky, kx) of output pixel p reads source pixel p + off with
        # off = (ky-1)*Wp + (kx-1).  The shift is a lane rotation (XLU); every
        # wrapped / out-of-image element is zeroed by the tap-validity mask,
        # so each tap is exactly one dense full-width store.
        for ky in range(3):
            for kx in range(3):
                t = ky * 3 + kx
                off = (ky - 1) * wp + (kx - 1)
                lo = t * c
                if off == 0:
                    dst_ref[lo:lo + c, :] = src
                else:
                    shifted = pltpu.roll(src, shift=(-off) % r, axis=1)
                    dst_ref[lo:lo + c, :] = shifted * mask_ref[t:t + 1, :]

    # ---------------- Conv1: im2col (tap-major) + single MXU matmul ----------
    pooled = pooled_ref[...]                                   # (Cin, R)
    im2col(pooled, col1_ref, cin)
    acc1 = jnp.dot(w1_ref[...], col1_ref[...],
                   preferred_element_type=jnp.float32)         # (Cmid, R)

    # ---------------- BatchNorm (batch stats, two-pass centered) + ReLU ------
    mu1 = jnp.sum(acc1, axis=1, keepdims=True) * inv_r
    c1 = acc1 - mu1
    var1 = jnp.sum(c1 * c1, axis=1, keepdims=True) * inv_r
    scale1 = g1_ref[...] * lax.rsqrt(var1 + BN_EPS)
    h1 = jnp.maximum(c1 * scale1 + b1_ref[...], 0.0)           # (Cmid, R)

    # ---------------- Conv2: im2col (tap-major) + single MXU matmul ----------
    im2col(h1, col2_ref, cmid)
    acc2 = jnp.dot(w2_ref[...], col2_ref[...],
                   preferred_element_type=jnp.float32)         # (Cout, R)

    # ---------------- BatchNorm + ReLU, lane-dense (Cout, R) store -----------
    mu2 = jnp.sum(acc2, axis=1, keepdims=True) * inv_r
    c2 = acc2 - mu2
    var2 = jnp.sum(c2 * c2, axis=1, keepdims=True) * inv_r
    scale2 = g2_ref[...] * lax.rsqrt(var2 + BN_EPS)
    o_ref[...] = jnp.maximum(c2 * scale2 + b2_ref[...], 0.0)


def _tap_masks(n, hp, wp):
    """(9, R) f32: mask[t, r] == 1 where tap t of output pixel r is inside the image."""
    yy = np.arange(hp).reshape(1, hp, 1)
    xx = np.arange(wp).reshape(1, 1, wp)
    rows = []
    for ky in range(3):
        for kx in range(3):
            dy, dx = ky - 1, kx - 1
            ok = (yy + dy >= 0) & (yy + dy < hp) & (xx + dx >= 0) & (xx + dx < wp)
            rows.append(np.broadcast_to(ok, (n, hp, wp)).reshape(-1))
    return np.stack(rows, axis=0).astype(np.float32)


@jax.jit
def down_forward(x_nchw, w1, g1, b1, w2, g2, b2):
    """Down.forward. x_nchw: (N, Cin, H, W) float32 -> (N, Cout, H/2, W/2)."""
    N, Cin, H, W = x_nchw.shape
    Hp, Wp = H // 2, W // 2
    Cmid = w1.shape[-1]
    Cout = w2.shape[-1]
    R = N * Hp * Wp

    # MaxPool2d(2) hoisted to a tiny XLA reshape+max; the kernel then receives
    # the pooled activations already channels-first with the flat pixel axis
    # (r = ((n*Hp)+y)*Wp + x) on lanes -> lane-dense (Cin, R) VMEM slab.
    xp = x_nchw.astype(jnp.float32).reshape(N, Cin, Hp, 2, Wp, 2).max(axis=(3, 5))
    pooled_cf = jnp.transpose(xp, (1, 0, 2, 3)).reshape(Cin, R)

    # Conv weights flattened to a single contraction axis ordered (ky, kx, c).
    w1t = jnp.transpose(w1.reshape(9 * Cin, Cmid)).astype(jnp.float32)    # (Cmid, 9*Cin)
    w2t = jnp.transpose(w2.reshape(9 * Cmid, Cout)).astype(jnp.float32)   # (Cout, 9*Cmid)
    g1c = g1.reshape(Cmid, 1).astype(jnp.float32)
    b1c = b1.reshape(Cmid, 1).astype(jnp.float32)
    g2c = g2.reshape(Cout, 1).astype(jnp.float32)
    b2c = b2.reshape(Cout, 1).astype(jnp.float32)

    # Single (9, R) tap-validity mask shared by both im2col passes.
    mask_tr = jnp.asarray(_tap_masks(N, Hp, Wp))

    kernel = functools.partial(_down_kernel, wp=Wp)
    out_cf = pl.pallas_call(
        kernel,
        out_shape=jax.ShapeDtypeStruct((Cout, R), jnp.float32),
        in_specs=[pl.BlockSpec(memory_space=pltpu.MemorySpace.VMEM)
                  for _ in range(8)],
        out_specs=pl.BlockSpec(memory_space=pltpu.MemorySpace.VMEM),
        scratch_shapes=[
            pltpu.VMEM((9 * Cin, R), jnp.float32),    # im2col for conv1, tap-major
            pltpu.VMEM((9 * Cmid, R), jnp.float32),   # im2col for conv2, tap-major
        ],
        compiler_params=pltpu.CompilerParams(vmem_limit_bytes=48 * 1024 * 1024),
    )(pooled_cf, w1t, g1c, b1c, w2t, g2c, b2c, mask_tr)

    # Back to PyTorch NCHW: only the two small leading axes move; the kernel's
    # store itself is the lane-dense (Cout, R) slab.
    return jnp.transpose(out_cf.reshape(Cout, N, Hp, Wp), (1, 0, 2, 3))


def init_params(key, in_channels, out_channels):
    """Deterministic synthetic parameters (shapes per Down.__init__)."""
    mid = out_channels
    k1, k2 = jax.random.split(key)
    # PyTorch Conv2d weight is (out, in, 3, 3); we keep it as (3, 3, in, out).
    w1 = 0.1 * jax.random.normal(k1, (3, 3, in_channels, mid), jnp.float32)
    w2 = 0.1 * jax.random.normal(k2, (3, 3, mid, out_channels), jnp.float32)
    # BatchNorm2d default init: weight=1, bias=0.
    g1 = jnp.ones((1, mid), jnp.float32)
    b1 = jnp.zeros((1, mid), jnp.float32)
    g2 = jnp.ones((1, out_channels), jnp.float32)
    b2 = jnp.zeros((1, out_channels), jnp.float32)
    return w1, g1, b1, w2, g2, b2


def ref_forward(x_nchw, w1, g1, b1, w2, g2, b2):
    """Pure-JAX (XLA) reference of Down.forward for validation."""
    N, C, H, W = x_nchw.shape
    xp = x_nchw.reshape(N, C, H // 2, 2, W // 2, 2).max(axis=(3, 5))

    def conv_bn_relu(x, w, g, b):
        wt = jnp.transpose(w, (3, 2, 0, 1))  # OIHW
        y = lax.conv_general_dilated(x, wt, (1, 1), [(1, 1), (1, 1)],
                                     dimension_numbers=("NCHW", "OIHW", "NCHW"))
        mu = y.mean(axis=(0, 2, 3), keepdims=True)
        var = ((y - mu) ** 2).mean(axis=(0, 2, 3), keepdims=True)
        y = (y - mu) / jnp.sqrt(var + BN_EPS) * g.reshape(1, -1, 1, 1) \
            + b.reshape(1, -1, 1, 1)
        return jnp.maximum(y, 0.0)

    return conv_bn_relu(conv_bn_relu(xp, w1, g1, b1), w2, g2, b2)


if __name__ == "__main__":
    key = jax.random.PRNGKey(0)
    kx, kp = jax.random.split(key)

    N, Cin, H, W = 2, 4, 16, 16
    Cout = 8

    x = jax.random.normal(kx, (N, Cin, H, W), jnp.float32)
    params = init_params(kp, Cin, Cout)

    y = down_forward(x, *params)
    jax.block_until_ready(y)

    assert y.shape == (N, Cout, H // 2, W // 2), y.shape
    y_ref = ref_forward(x, *params)
    max_err = float(jnp.max(jnp.abs(y - y_ref)))
    assert max_err < 1e-3, f"max abs err vs reference = {max_err}"

    print("KERNEL_OK")
</pallas_src>

<mosaic_0001>
module attributes {stable_mosaic.version = 11 : i64} {
  func.func @_down_kernel(%arg0: memref<4x128xf32, #tpu.memory_space<vmem>>, %arg1: memref<8x36xf32, #tpu.memory_space<vmem>>, %arg2: memref<8x1xf32, #tpu.memory_space<vmem>>, %arg3: memref<8x1xf32, #tpu.memory_space<vmem>>, %arg4: memref<8x72xf32, #tpu.memory_space<vmem>>, %arg5: memref<8x1xf32, #tpu.memory_space<vmem>>, %arg6: memref<8x1xf32, #tpu.memory_space<vmem>>, %arg7: memref<9x128xf32, #tpu.memory_space<vmem>>, %arg8: memref<8x128xf32, #tpu.memory_space<vmem>>, %arg9: memref<36x128xf32, #tpu.memory_space<vmem>>, %arg10: memref<72x128xf32, #tpu.memory_space<vmem>>) attributes {dimension_semantics = [], scalar_prefetch = 0 : i64, scratch_operands = 2 : i64, tpu.core_type = #tpu.core_type<tc>} {
    %c0 = arith.constant 0 : index
    %c0_0 = arith.constant 0 : index
    %0 = vector.load %arg0[%c0, %c0_0] : memref<4x128xf32, #tpu.memory_space<vmem>>, vector<4x128xf32>
    %c9_i32 = arith.constant 9 : i32
    %1 = tpu.dynamic_rotate %0 by %c9_i32 dim 1 : vector<4x128xf32>, i32 -> vector<4x128xf32>
    %c0_1 = arith.constant 0 : index
    %c0_2 = arith.constant 0 : index
    %2 = vector.load %arg7[%c0_1, %c0_2] : memref<9x128xf32, #tpu.memory_space<vmem>>, vector<1x128xf32>
    %3 = vector.broadcast %2 : vector<1x128xf32> to vector<4x128xf32>
    %4 = arith.mulf %1, %3 : vector<4x128xf32>
    %c0_3 = arith.constant 0 : index
    %c0_4 = arith.constant 0 : index
    %5 = vector.load %arg9[%c0_3, %c0_4] : memref<36x128xf32, #tpu.memory_space<vmem>>, vector<4x128xf32>
    tpu.vector_store %arg9[%c0_3, %c0_4], %4 {strides = array<i32>} : memref<36x128xf32, #tpu.memory_space<vmem>>, vector<4x128xf32>,
    %c8_i32 = arith.constant 8 : i32
    %6 = tpu.dynamic_rotate %0 by %c8_i32 dim 1 : vector<4x128xf32>, i32 -> vector<4x128xf32>
    %c1 = arith.constant 1 : index
    %c0_5 = arith.constant 0 : index
    %7 = vector.load %arg7[%c1, %c0_5] : memref<9x128xf32, #tpu.memory_space<vmem>>, vector<1x128xf32>
    %8 = vector.broadcast %7 : vector<1x128xf32> to vector<4x128xf32>
    %9 = arith.mulf %6, %8 : vector<4x128xf32>
    %c4 = arith.constant 4 : index
    %c0_6 = arith.constant 0 : index
    %10 = vector.load %arg9[%c4, %c0_6] : memref<36x128xf32, #tpu.memory_space<vmem>>, vector<4x128xf32>
    tpu.vector_store %arg9[%c4, %c0_6], %9 {strides = array<i32>} : memref<36x128xf32, #tpu.memory_space<vmem>>, vector<4x128xf32>,
    %c7_i32 = arith.constant 7 : i32
    %11 = tpu.dynamic_rotate %0 by %c7_i32 dim 1 : vector<4x128xf32>, i32 -> vector<4x128xf32>
    %c2 = arith.constant 2 : index
    %c0_7 = arith.constant 0 : index
    %12 = vector.load %arg7[%c2, %c0_7] : memref<9x128xf32, #tpu.memory_space<vmem>>, vector<1x128xf32>
    %13 = vector.broadcast %12 : vector<1x128xf32> to vector<4x128xf32>
    %14 = arith.mulf %11, %13 : vector<4x128xf32>
    %c8 = arith.constant 8 : index
    %c0_8 = arith.constant 0 : index
    %15 = vector.load %arg9[%c8, %c0_8] : memref<36x128xf32, #tpu.memory_space<vmem>>, vector<4x128xf32>
    tpu.vector_store %arg9[%c8, %c0_8], %14 {strides = array<i32>} : memref<36x128xf32, #tpu.memory_space<vmem>>, vector<4x128xf32>,
    %c1_i32 = arith.constant 1 : i32
    %16 = tpu.dynamic_rotate %0 by %c1_i32 dim 1 : vector<4x128xf32>, i32 -> vector<4x128xf32>
    %c3 = arith.constant 3 : index
    %c0_9 = arith.constant 0 : index
    %17 = vector.load %arg7[%c3, %c0_9] : memref<9x128xf32, #tpu.memory_space<vmem>>, vector<1x128xf32>
    %18 = vector.broadcast %17 : vector<1x128xf32> to vector<4x128xf32>
    %19 = arith.mulf %16, %18 : vector<4x128xf32>
    %c12 = arith.constant 12 : index
    %c0_10 = arith.constant 0 : index
    %20 = vector.load %arg9[%c12, %c0_10] : memref<36x128xf32, #tpu.memory_space<vmem>>, vector<4x128xf32>
    tpu.vector_store %arg9[%c12, %c0_10], %19 {strides = array<i32>} : memref<36x128xf32, #tpu.memory_space<vmem>>, vector<4x128xf32>,
    %c16 = arith.constant 16 : index
    %c0_11 = arith.constant 0 : index
    %21 = vector.load %arg9[%c16, %c0_11] : memref<36x128xf32, #tpu.memory_space<vmem>>, vector<4x128xf32>
    tpu.vector_store %arg9[%c16, %c0_11], %0 {strides = array<i32>} : memref<36x128xf32, #tpu.memory_space<vmem>>, vector<4x128xf32>,
    %c127_i32 = arith.constant 127 : i32
    %22 = tpu.dynamic_rotate %0 by %c127_i32 dim 1 : vector<4x128xf32>, i32 -> vector<4x128xf32>
    %c5 = arith.constant 5 : index
    %c0_12 = arith.constant 0 : index
    %23 = vector.load %arg7[%c5, %c0_12] : memref<9x128xf32, #tpu.memory_space<vmem>>, vector<1x128xf32>
    %24 = vector.broadcast %23 : vector<1x128xf32> to vector<4x128xf32>
    %25 = arith.mulf %22, %24 : vector<4x128xf32>
    %c20 = arith.constant 20 : index
    %c0_13 = arith.constant 0 : index
    %26 = vector.load %arg9[%c20, %c0_13] : memref<36x128xf32, #tpu.memory_space<vmem>>, vector<4x128xf32>
    tpu.vector_store %arg9[%c20, %c0_13], %25 {strides = array<i32>} : memref<36x128xf32, #tpu.memory_space<vmem>>, vector<4x128xf32>,
    %c121_i32 = arith.constant 121 : i32
    %27 = tpu.dynamic_rotate %0 by %c121_i32 dim 1 : vector<4x128xf32>, i32 -> vector<4x128xf32>
    %c6 = arith.constant 6 : index
    %c0_14 = arith.constant 0 : index
    %28 = vector.load %arg7[%c6, %c0_14] : memref<9x128xf32, #tpu.memory_space<vmem>>, vector<1x128xf32>
    %29 = vector.broadcast %28 : vector<1x128xf32> to vector<4x128xf32>
    %30 = arith.mulf %27, %29 : vector<4x128xf32>
    %c24 = arith.constant 24 : index
    %c0_15 = arith.constant 0 : index
    %31 = vector.load %arg9[%c24, %c0_15] : memref<36x128xf32, #tpu.memory_space<vmem>>, vector<4x128xf32>
    tpu.vector_store %arg9[%c24, %c0_15], %30 {strides = array<i32>} : memref<36x128xf32, #tpu.memory_space<vmem>>, vector<4x128xf32>,
    %c120_i32 = arith.constant 120 : i32
    %32 = tpu.dynamic_rotate %0 by %c120_i32 dim 1 : vector<4x128xf32>, i32 -> vector<4x128xf32>
    %c7 = arith.constant 7 : index
    %c0_16 = arith.constant 0 : index
    %33 = vector.load %arg7[%c7, %c0_16] : memref<9x128xf32, #tpu.memory_space<vmem>>, vector<1x128xf32>
    %34 = vector.broadcast %33 : vector<1x128xf32> to vector<4x128xf32>
    %35 = arith.mulf %32, %34 : vector<4x128xf32>
    %c28 = arith.constant 28 : index
    %c0_17 = arith.constant 0 : index
    %36 = vector.load %arg9[%c28, %c0_17] : memref<36x128xf32, #tpu.memory_space<vmem>>, vector<4x128xf32>
    tpu.vector_store %arg9[%c28, %c0_17], %35 {strides = array<i32>} : memref<36x128xf32, #tpu.memory_space<vmem>>, vector<4x128xf32>,
    %c119_i32 = arith.constant 119 : i32
    %37 = tpu.dynamic_rotate %0 by %c119_i32 dim 1 : vector<4x128xf32>, i32 -> vector<4x128xf32>
    %c8_18 = arith.constant 8 : index
    %c0_19 = arith.constant 0 : index
    %38 = vector.load %arg7[%c8_18, %c0_19] : memref<9x128xf32, #tpu.memory_space<vmem>>, vector<1x128xf32>
    %39 = vector.broadcast %38 : vector<1x128xf32> to vector<4x128xf32>
    %40 = arith.mulf %37, %39 : vector<4x128xf32>
    %c32 = arith.constant 32 : index
    %c0_20 = arith.constant 0 : index
    %41 = vector.load %arg9[%c32, %c0_20] : memref<36x128xf32, #tpu.memory_space<vmem>>, vector<4x128xf32>
    tpu.vector_store %arg9[%c32, %c0_20], %40 {strides = array<i32>} : memref<36x128xf32, #tpu.memory_space<vmem>>, vector<4x128xf32>,
    %c0_21 = arith.constant 0 : index
    %c0_22 = arith.constant 0 : index
    %42 = vector.load %arg1[%c0_21, %c0_22] : memref<8x36xf32, #tpu.memory_space<vmem>>, vector<8x36xf32>
    %c0_23 = arith.constant 0 : index
    %c0_24 = arith.constant 0 : index
    %43 = vector.load %arg9[%c0_23, %c0_24] : memref<36x128xf32, #tpu.memory_space<vmem>>, vector<36x128xf32>
    %cst = arith.constant dense<0.000000e+00> : vector<8x128xf32>
    %44 = tpu.matmul %42, %43, %cst {dimension_numbers = #tpu.dot_dimension_numbers<[1], [0], [0], [1], [0, 0, 1, 1], [], []>} : vector<8x36xf32>, vector<36x128xf32>, vector<8x128xf32> -> vector<8x128xf32>
    %cst_25 = arith.constant dense<0.000000e+00> : vector<8xf32>
    %45 = vector.multi_reduction <add>, %44, %cst_25 [1] : vector<8x128xf32> to vector<8xf32>
    %46 = vector.shape_cast %45 : vector<8xf32> to vector<8x1xf32>
    %cst_26 = arith.constant 7.812500e-03 : f32
    %47 = vector.broadcast %cst_26 : f32 to vector<8x1xf32>
    %48 = arith.mulf %46, %47 : vector<8x1xf32>
    %49 = vector.broadcast %48 : vector<8x1xf32> to vector<8x128xf32>
    %50 = arith.subf %44, %49 : vector<8x128xf32>
    %51 = arith.mulf %50, %50 : vector<8x128xf32>
    %cst_27 = arith.constant dense<0.000000e+00> : vector<8xf32>
    %52 = vector.multi_reduction <add>, %51, %cst_27 [1] : vector<8x128xf32> to vector<8xf32>
    %53 = vector.shape_cast %52 : vector<8xf32> to vector<8x1xf32>
    %cst_28 = arith.constant 7.812500e-03 : f32
    %54 = vector.broadcast %cst_28 : f32 to vector<8x1xf32>
    %55 = arith.mulf %53, %54 : vector<8x1xf32>
    %c0_29 = arith.constant 0 : index
    %c0_30 = arith.constant 0 : index
    %56 = vector.load %arg2[%c0_29, %c0_30] : memref<8x1xf32, #tpu.memory_space<vmem>>, vector<8x1xf32>
    %cst_31 = arith.constant 9.99999974E-6 : f32
    %57 = vector.broadcast %cst_31 : f32 to vector<8x1xf32>
    %58 = arith.addf %55, %57 : vector<8x1xf32>
    %59 = math.rsqrt %58 : vector<8x1xf32>
    %60 = arith.mulf %56, %59 : vector<8x1xf32>
    %61 = vector.broadcast %60 : vector<8x1xf32> to vector<8x128xf32>
    %62 = arith.mulf %50, %61 : vector<8x128xf32>
    %c0_32 = arith.constant 0 : index
    %c0_33 = arith.constant 0 : index
    %63 = vector.load %arg3[%c0_32, %c0_33] : memref<8x1xf32, #tpu.memory_space<vmem>>, vector<8x1xf32>
    %64 = vector.broadcast %63 : vector<8x1xf32> to vector<8x128xf32>
    %65 = arith.addf %62, %64 : vector<8x128xf32>
    %cst_34 = arith.constant 0.000000e+00 : f32
    %66 = vector.broadcast %cst_34 : f32 to vector<8x128xf32>
    %67 = arith.maximumf %65, %66 : vector<8x128xf32>
    %c9_i32_35 = arith.constant 9 : i32
    %68 = tpu.dynamic_rotate %67 by %c9_i32_35 dim 1 : vector<8x128xf32>, i32 -> vector<8x128xf32>
    %c0_36 = arith.constant 0 : index
    %c0_37 = arith.constant 0 : index
    %69 = vector.load %arg7[%c0_36, %c0_37] : memref<9x128xf32, #tpu.memory_space<vmem>>, vector<1x128xf32>
    %70 = vector.broadcast %69 : vector<1x128xf32> to vector<8x128xf32>
    %71 = arith.mulf %68, %70 : vector<8x128xf32>
    %c0_38 = arith.constant 0 : index
    %c0_39 = arith.constant 0 : index
    %72 = vector.load %arg10[%c0_38, %c0_39] : memref<72x128xf32, #tpu.memory_space<vmem>>, vector<8x128xf32>
    tpu.vector_store %arg10[%c0_38, %c0_39], %71 {strides = array<i32>} : memref<72x128xf32, #tpu.memory_space<vmem>>, vector<8x128xf32>,
    %c8_i32_40 = arith.constant 8 : i32
    %73 = tpu.dynamic_rotate %67 by %c8_i32_40 dim 1 : vector<8x128xf32>, i32 -> vector<8x128xf32>
    %c1_41 = arith.constant 1 : index
    %c0_42 = arith.constant 0 : index
    %74 = vector.load %arg7[%c1_41, %c0_42] : memref<9x128xf32, #tpu.memory_space<vmem>>, vector<1x128xf32>
    %75 = vector.broadcast %74 : vector<1x128xf32> to vector<8x128xf32>
    %76 = arith.mulf %73, %75 : vector<8x128xf32>
    %c8_43 = arith.constant 8 : index
    %c0_44 = arith.constant 0 : index
    %77 = vector.load %arg10[%c8_43, %c0_44] : memref<72x128xf32, #tpu.memory_space<vmem>>, vector<8x128xf32>
    tpu.vector_store %arg10[%c8_43, %c0_44], %76 {strides = array<i32>} : memref<72x128xf32, #tpu.memory_space<vmem>>, vector<8x128xf32>,
    %c7_i32_45 = arith.constant 7 : i32
    %78 = tpu.dynamic_rotate %67 by %c7_i32_45 dim 1 : vector<8x128xf32>, i32 -> vector<8x128xf32>
    %c2_46 = arith.constant 2 : index
    %c0_47 = arith.constant 0 : index
    %79 = vector.load %arg7[%c2_46, %c0_47] : memref<9x128xf32, #tpu.memory_space<vmem>>, vector<1x128xf32>
    %80 = vector.broadcast %79 : vector<1x128xf32> to vector<8x128xf32>
    %81 = arith.mulf %78, %80 : vector<8x128xf32>
    %c16_48 = arith.constant 16 : index
    %c0_49 = arith.constant 0 : index
    %82 = vector.load %arg10[%c16_48, %c0_49] : memref<72x128xf32, #tpu.memory_space<vmem>>, vector<8x128xf32>
    tpu.vector_store %arg10[%c16_48, %c0_49], %81 {strides = array<i32>} : memref<72x128xf32, #tpu.memory_space<vmem>>, vector<8x128xf32>,
    %c1_i32_50 = arith.constant 1 : i32
    %83 = tpu.dynamic_rotate %67 by %c1_i32_50 dim 1 : vector<8x128xf32>, i32 -> vector<8x128xf32>
    %c3_51 = arith.constant 3 : index
    %c0_52 = arith.constant 0 : index
    %84 = vector.load %arg7[%c3_51, %c0_52] : memref<9x128xf32, #tpu.memory_space<vmem>>, vector<1x128xf32>
    %85 = vector.broadcast %84 : vector<1x128xf32> to vector<8x128xf32>
    %86 = arith.mulf %83, %85 : vector<8x128xf32>
    %c24_53 = arith.constant 24 : index
    %c0_54 = arith.constant 0 : index
    %87 = vector.load %arg10[%c24_53, %c0_54] : memref<72x128xf32, #tpu.memory_space<vmem>>, vector<8x128xf32>
    tpu.vector_store %arg10[%c24_53, %c0_54], %86 {strides = array<i32>} : memref<72x128xf32, #tpu.memory_space<vmem>>, vector<8x128xf32>,
    %c32_55 = arith.constant 32 : index
    %c0_56 = arith.constant 0 : index
    %88 = vector.load %arg10[%c32_55, %c0_56] : memref<72x128xf32, #tpu.memory_space<vmem>>, vector<8x128xf32>
    tpu.vector_store %arg10[%c32_55, %c0_56], %67 {strides = array<i32>} : memref<72x128xf32, #tpu.memory_space<vmem>>, vector<8x128xf32>,
    %c127_i32_57 = arith.constant 127 : i32
    %89 = tpu.dynamic_rotate %67 by %c127_i32_57 dim 1 : vector<8x128xf32>, i32 -> vector<8x128xf32>
    %c5_58 = arith.constant 5 : index
    %c0_59 = arith.constant 0 : index
    %90 = vector.load %arg7[%c5_58, %c0_59] : memref<9x128xf32, #tpu.memory_space<vmem>>, vector<1x128xf32>
    %91 = vector.broadcast %90 : vector<1x128xf32> to vector<8x128xf32>
    %92 = arith.mulf %89, %91 : vector<8x128xf32>
    %c40 = arith.constant 40 : index
    %c0_60 = arith.constant 0 : index
    %93 = vector.load %arg10[%c40, %c0_60] : memref<72x128xf32, #tpu.memory_space<vmem>>, vector<8x128xf32>
    tpu.vector_store %arg10[%c40, %c0_60], %92 {strides = array<i32>} : memref<72x128xf32, #tpu.memory_space<vmem>>, vector<8x128xf32>,
    %c121_i32_61 = arith.constant 121 : i32
    %94 = tpu.dynamic_rotate %67 by %c121_i32_61 dim 1 : vector<8x128xf32>, i32 -> vector<8x128xf32>
    %c6_62 = arith.constant 6 : index
    %c0_63 = arith.constant 0 : index
    %95 = vector.load %arg7[%c6_62, %c0_63] : memref<9x128xf32, #tpu.memory_space<vmem>>, vector<1x128xf32>
    %96 = vector.broadcast %95 : vector<1x128xf32> to vector<8x128xf32>
    %97 = arith.mulf %94, %96 : vector<8x128xf32>
    %c48 = arith.constant 48 : index
    %c0_64 = arith.constant 0 : index
    %98 = vector.load %arg10[%c48, %c0_64] : memref<72x128xf32, #tpu.memory_space<vmem>>, vector<8x128xf32>
    tpu.vector_store %arg10[%c48, %c0_64], %97 {strides = array<i32>} : memref<72x128xf32, #tpu.memory_space<vmem>>, vector<8x128xf32>,
    %c120_i32_65 = arith.constant 120 : i32
    %99 = tpu.dynamic_rotate %67 by %c120_i32_65 dim 1 : vector<8x128xf32>, i32 -> vector<8x128xf32>
    %c7_66 = arith.constant 7 : index
    %c0_67 = arith.constant 0 : index
    %100 = vector.load %arg7[%c7_66, %c0_67] : memref<9x128xf32, #tpu.memory_space<vmem>>, vector<1x128xf32>
    %101 = vector.broadcast %100 : vector<1x128xf32> to vector<8x128xf32>
    %102 = arith.mulf %99, %101 : vector<8x128xf32>
    %c56 = arith.constant 56 : index
    %c0_68 = arith.constant 0 : index
    %103 = vector.load %arg10[%c56, %c0_68] : memref<72x128xf32, #tpu.memory_space<vmem>>, vector<8x128xf32>
    tpu.vector_store %arg10[%c56, %c0_68], %102 {strides = array<i32>} : memref<72x128xf32, #tpu.memory_space<vmem>>, vector<8x128xf32>,
    %c119_i32_69 = arith.constant 119 : i32
    %104 = tpu.dynamic_rotate %67 by %c119_i32_69 dim 1 : vector<8x128xf32>, i32 -> vector<8x128xf32>
    %c8_70 = arith.constant 8 : index
    %c0_71 = arith.constant 0 : index
    %105 = vector.load %arg7[%c8_70, %c0_71] : memref<9x128xf32, #tpu.memory_space<vmem>>, vector<1x128xf32>
    %106 = vector.broadcast %105 : vector<1x128xf32> to vector<8x128xf32>
    %107 = arith.mulf %104, %106 : vector<8x128xf32>
    %c64 = arith.constant 64 : index
    %c0_72 = arith.constant 0 : index
    %108 = vector.load %arg10[%c64, %c0_72] : memref<72x128xf32, #tpu.memory_space<vmem>>, vector<8x128xf32>
    tpu.vector_store %arg10[%c64, %c0_72], %107 {strides = array<i32>} : memref<72x128xf32, #tpu.memory_space<vmem>>, vector<8x128xf32>,
    %c0_73 = arith.constant 0 : index
    %c0_74 = arith.constant 0 : index
    %109 = vector.load %arg4[%c0_73, %c0_74] : memref<8x72xf32, #tpu.memory_space<vmem>>, vector<8x72xf32>
    %c0_75 = arith.constant 0 : index
    %c0_76 = arith.constant 0 : index
    %110 = vector.load %arg10[%c0_75, %c0_76] : memref<72x128xf32, #tpu.memory_space<vmem>>, vector<72x128xf32>
    %cst_77 = arith.constant dense<0.000000e+00> : vector<8x128xf32>
    %111 = tpu.matmul %109, %110, %cst_77 {dimension_numbers = #tpu.dot_dimension_numbers<[1], [0], [0], [1], [0, 0, 1, 1], [], []>} : vector<8x72xf32>, vector<72x128xf32>, vector<8x128xf32> -> vector<8x128xf32>
    %cst_78 = arith.constant dense<0.000000e+00> : vector<8xf32>
    %112 = vector.multi_reduction <add>, %111, %cst_78 [1] : vector<8x128xf32> to vector<8xf32>
    %113 = vector.shape_cast %112 : vector<8xf32> to vector<8x1xf32>
    %cst_79 = arith.constant 7.812500e-03 : f32
    %114 = vector.broadcast %cst_79 : f32 to vector<8x1xf32>
    %115 = arith.mulf %113, %114 : vector<8x1xf32>
    %116 = vector.broadcast %115 : vector<8x1xf32> to vector<8x128xf32>
    %117 = arith.subf %111, %116 : vector<8x128xf32>
    %118 = arith.mulf %117, %117 : vector<8x128xf32>
    %cst_80 = arith.constant dense<0.000000e+00> : vector<8xf32>
    %119 = vector.multi_reduction <add>, %118, %cst_80 [1] : vector<8x128xf32> to vector<8xf32>
    %120 = vector.shape_cast %119 : vector<8xf32> to vector<8x1xf32>
    %cst_81 = arith.constant 7.812500e-03 : f32
    %121 = vector.broadcast %cst_81 : f32 to vector<8x1xf32>
    %122 = arith.mulf %120, %121 : vector<8x1xf32>
    %c0_82 = arith.constant 0 : index
    %c0_83 = arith.constant 0 : index
    %123 = vector.load %arg5[%c0_82, %c0_83] : memref<8x1xf32, #tpu.memory_space<vmem>>, vector<8x1xf32>
    %cst_84 = arith.constant 9.99999974E-6 : f32
    %124 = vector.broadcast %cst_84 : f32 to vector<8x1xf32>
    %125 = arith.addf %122, %124 : vector<8x1xf32>
    %126 = math.rsqrt %125 : vector<8x1xf32>
    %127 = arith.mulf %123, %126 : vector<8x1xf32>
    %128 = vector.broadcast %127 : vector<8x1xf32> to vector<8x128xf32>
    %129 = arith.mulf %117, %128 : vector<8x128xf32>
    %c0_85 = arith.constant 0 : index
    %c0_86 = arith.constant 0 : index
    %130 = vector.load %arg6[%c0_85, %c0_86] : memref<8x1xf32, #tpu.memory_space<vmem>>, vector<8x1xf32>
    %131 = vector.broadcast %130 : vector<8x1xf32> to vector<8x128xf32>
    %132 = arith.addf %129, %131 : vector<8x128xf32>
    %cst_87 = arith.constant 0.000000e+00 : f32
    %133 = vector.broadcast %cst_87 : f32 to vector<8x128xf32>
    %134 = arith.maximumf %132, %133 : vector<8x128xf32>
    %c0_88 = arith.constant 0 : index
    %c0_89 = arith.constant 0 : index
    %135 = vector.load %arg8[%c0_88, %c0_89] : memref<8x128xf32, #tpu.memory_space<vmem>>, vector<8x128xf32>
    tpu.vector_store %arg8[%c0_88, %c0_89], %134 {strides = array<i32>} : memref<8x128xf32, #tpu.memory_space<vmem>>, vector<8x128xf32>,
    return
  }
}

</mosaic_0001>

<bundles_post_ra>
// kernel: down_forward.1
= control target key start
LH: loop header
LB: loop body
LE: loop exit
PB: predicated region body
PF: predicated region fallthrough
CT: control target
= control target key end

     0   :  { %s506_s29 = smov 7   ;;  %s507_s30 = smov 9   ;;  %v508_v1 = vmov 0.0|0.0   ;;  %vm515_vm0 = vmmov 0   ;;  %v516_v2 = vmov 0.0   ;;  %vm113_vm1 = vcmask 1043456   ;;  %s669_s0 = inlined_call_operand.vmem [shape: f32[4,128], index: 0, kind: input, shape index: {}]   ;;  %s670_s7 = inlined_call_operand.vmem [shape: f32[9,128], index: 7, kind: input, shape index: {}]   ;;  %s671_s1 = inlined_call_operand.vmem [shape: f32[8,36], index: 1, kind: input, shape index: {}]   ;;  %s672_s3 = inlined_call_operand.vmem [shape: f32[8,1], index: 3, kind: input, shape index: {}]   ;;  %s673_s2 = inlined_call_operand.vmem [shape: f32[8,1], index: 2, kind: input, shape index: {}]   ;;  %s674_s4 = inlined_call_operand.vmem [shape: f32[8,72], index: 4, kind: input, shape index: {}]   ;;  %s675_s6 = inlined_call_operand.vmem [shape: f32[8,1], index: 6, kind: input, shape index: {}]   ;;  %s676_s5 = inlined_call_operand.vmem [shape: f32[8,1], index: 5, kind: input, shape index: {}]   ;;  %s677_s8 = inlined_call_operand.vmem [shape: f32[8,128], index: 8, kind: output, shape index: {}]  }
   0x1   :  { %v29_v0 = vld [vmem:[%s669_s0] sm:$0xf]  ;;  %470 = vmatprep.subr.bf16.mxu0 %v508_v1  ;;  %476 = vmatprep.subr.bf16.mxu1 %v508_v1  ;;  %s509_s9 = smov 1   ;;  %s510_s10 = smov 8   ;;  %v605_v15 = vld [vmem:[%s670_s7 + $0x5] ss:$0 sm:$0xff] }
   0x2   :  { %48 = vrot.lane.b32.xlu1 %v29_v0, %s506_s29  ;;  %66 = vst [vmem:[#allocation2 + $0x10] sm:$0xf] %v29_v0  ;;  %30 = vrot.lane.b32.xlu0 %v29_v0, %s507_s30  ;;  %s511_s11 = smov 127   ;;  %s512_s0 = smov 121   ;;  %v581_v3 = vld [vmem:[%s670_s7 + $0x2] ss:$0 sm:$0xff] }
   0x3   :  { %s513_s12 = smov 120   ;;  %s514_s13 = smov 119   ;;  %446 = vmatprep.mubr.msk.f32.mxu0 %vm515_vm0, %v516_v2  ;;  %467 = vmatprep.mubr.msk.f32.mxu1 %vm515_vm0, %v516_v2  ;;  %v586_v4 = vld [vmem:[%s670_s7] ss:$0 sm:$0xff]  ;;  %v593_v9 = vld [vmem:[%s670_s7 + $0x3] ss:$0 sm:$0xff] }
   0x4   :  { %v598_v10 = vld [vmem:[%s670_s7 + $0x1] ss:$0 sm:$0xff]  ;;  %v610_v16 = vld [vmem:[%s670_s7 + $0x6] ss:$0 sm:$0xff]  ;;  %v617_v21 = vld [vmem:[%s670_s7 + $0x7] ss:$0 sm:$0xff] }
   0x5   :  { %v622_v22 = vld [vmem:[%s670_s7 + $0x8] ss:$0 sm:$0xff]  ;;  %v103_v34 = vld [vmem:[%s671_s1] sm:$0xff]  ;;  %vm109_vm2 = vcmask 293888   ;;  %v517_v41 = vmov 0   ;;  %vm296_vm3 = vcmask 588800  }
   0x6   :  { %57 = vrot.lane.b32.xlu1 %v29_v0, %s509_s9  ;;  %39 = vrot.lane.b32.xlu0 %v29_v0, %s510_s10  ;;  %v205_v42 = vld [vmem:[%s672_s3] sm:$0xff] }
   0x7   :  { %500 = vset.pattern.permute.xlu0 %v517_v41  ;;  %501 = vset.pattern.permute.xlu1 %v517_v41  ;;  %v195_v46 = vld [vmem:[%s673_s2] sm:$0xff] }
   0xa   :  { %67 = vrot.lane.b32.xlu0 %v29_v0, %s511_s11  ;;  %76 = vrot.lane.b32.xlu1 %v29_v0, %s512_s0 }
   0xe   :  { %85 = vrot.lane.b32.xlu0 %v29_v0, %s513_s12  ;;  %94 = vrot.lane.b32.xlu1 %v29_v0, %s514_s13 }
  0x74   :  { %v49_v5 = vpop.permute.xlu1 %48  ;;  %v31_v6 = vpop.permute.xlu0 %30 }
  0x75   :  { %v55_v7 = vmul.f32 %v581_v3, %v49_v5  ;;  %v37_v8 = vmul.f32 %v586_v4, %v31_v6 }
  0x77   :  { %56 = vst [vmem:[#allocation2 + $0x8] sm:$0xf] %v55_v7  ;;  %38 = vst [vmem:[#allocation2] sm:$0xf] %v37_v8 }
  0x78   :  { %v58_v11 = vpop.permute.xlu1 %57  ;;  %v40_v12 = vpop.permute.xlu0 %39 }
  0x79   :  { %v64_v13 = vmul.f32 %v593_v9, %v58_v11  ;;  %v46_v14 = vmul.f32 %v598_v10, %v40_v12  ;;  %v286_v12 = vld [vmem:[%s674_s4] sm:$0xff] }
  0x7b   :  { %65 = vst [vmem:[#allocation2 + $0xc] sm:$0xf] %v64_v13  ;;  %47 = vst [vmem:[#allocation2 + $0x4] sm:$0xf] %v46_v14 }
  0x7c   :  { %v68_v17 = vpop.permute.xlu0 %67  ;;  %v77_v18 = vpop.permute.xlu1 %76 }
  0x7d   :  { %v74_v19 = vmul.f32 %v605_v15, %v68_v17  ;;  %v83_v20 = vmul.f32 %v610_v16, %v77_v18 }
  0x7f   :  { %75 = vst [vmem:[#allocation2 + $0x14] sm:$0xf] %v74_v19  ;;  %84 = vst [vmem:[#allocation2 + $0x18] sm:$0xf] %v83_v20 }
  0x80   :  { %v86_v23 = vpop.permute.xlu0 %85  ;;  %v95_v24 = vpop.permute.xlu1 %94 }
  0x81   :  { %v92_v25 = vmul.f32 %v617_v21, %v86_v23  ;;  %v101_v26 = vmul.f32 %v622_v22, %v95_v24 }
  0x82   :  { %v104_v27 = vld [vmem:[#allocation2] sm:$0xff]  ;;  %v105_v28 = vld [vmem:[#allocation2 + $0x8] sm:$0xff] }
  0x83   :  { %93 = vst [vmem:[#allocation2 + $0x1c] sm:$0xf] %v92_v25  ;;  %v471_v29 = vpack.c.bf16 %v105_v28, %v104_v27  ;;  %102 = vst [vmem:[#allocation2 + $0x20] sm:$0xf] %v101_v26 }
  0x85   :  { %472 = vmatpush3.bf16.msra.mxu0 %v471_v29 }
  0x86   :  { %473 = vmatprep.subr.bf16.mxu0 %v508_v1  ;;  %v106_v30 = vld [vmem:[#allocation2 + $0x10] sm:$0xff] }
  0x8a   :  { %v107_v31 = vld [vmem:[#allocation2 + $0x18] sm:$0xff]  ;;  %v108_v33 = vld [vmem:[#allocation2 + $0x20] sm:$0xf] }
  0x8b   :  { %v474_v32 = vpack.c.bf16 %v107_v31, %v106_v30 }
  0x8d   :  { %475 = vmatpush3.bf16.msra.mxu0 %v474_v32 }
  0x8e   :  { %444 = vmatprep.subr.mxu0 %v516_v2 }
  0x91   :  { %445 = vmatpush3.msk.msra.mxu0 %vm113_vm1, %v108_v33 }
  0x92   :  { %447 = vmatmul.mubr.msk.f32.vlgmr.msra.gmra.mrb[0].mxu0 %vm109_vm2, %v103_v34 }
 0x165   :  { %v183_v35 = vpop.f32.mrb[0].mxu0 }
 0x166   :  { %187 = vadd.xlane.f32.xlu0 %v183_v35  ;;  %v448_v36 = vpop.f32.mrb[1].mxu0 }
 0x1f3   :  { %v188_v37 = vpop.xlane.xlu0 %187 }
 0x1f4   :  { %v189_v38 = vmul.f32 0.0078125, %v188_v37 }
 0x1f6   :  { %v190_v39 = vsub.f32 %v183_v35, %v189_v38 }
 0x1f8   :  { %v191_v40 = vmul.f32 %v190_v39, %v190_v39 }
 0x1fa   :  { %192 = vadd.xlane.f32.xlu1 %v191_v40 }
 0x20b   :  { %208 = vperm.xlu1 %501, %v205_v42  }
 0x287   :  { %v193_v43 = vpop.xlane.xlu1 %192 }
 0x288   :  { %v194_v44 = vmul.f32 0.0078125, %v193_v43 }
 0x28a   :  { %v196_v45 = vadd.f32 1e-05, %v194_v44 }
 0x28b   :  { %v209_v50 = vpop.permute.xlu1 %208 }
 0x28c   :  { %502 = vrsqrt.f32 %v196_v45 }
 0x296   :  { %v503_v47 = vpop.eup %502 }
 0x297   :  { %v198_v48 = vmul.f32 %v503_v47, %v195_v46 }
 0x299   :  { %201 = vperm.xlu0 %500, %v198_v48  }
 0x318   :  { %v202_v49 = vpop.permute.xlu0 %201 }
 0x319   :  { %v204_v51 = vmul.f32 %v202_v49, %v190_v39 }
 0x31b   :  { %v211_v52 = vadd.f32 %v209_v50, %v204_v51 }
 0x31d   :  { %v212_v53 = vmax.f32 %v211_v52, 0.0 }
 0x31f   :  { %268 = vrot.lane.b32.xlu0 %v212_v53, %s513_s12  ;;  %213 = vrot.lane.b32.xlu1 %v212_v53, %s507_s30 }
 0x323   :  { %222 = vrot.lane.b32.xlu1 %v212_v53, %s510_s10 }
 0x327   :  { %231 = vrot.lane.b32.xlu1 %v212_v53, %s506_s29 }
 0x32b   :  { %240 = vrot.lane.b32.xlu1 %v212_v53, %s509_s9 }
 0x32f   :  { %250 = vrot.lane.b32.xlu1 %v212_v53, %s511_s11 }
 0x333   :  { %259 = vrot.lane.b32.xlu1 %v212_v53, %s512_s0 }
 0x337   :  { %277 = vrot.lane.b32.xlu1 %v212_v53, %s514_s13 }
 0x391   :  { %v214_v54 = vpop.permute.xlu1 %213  ;;  %v269_v6 = vpop.permute.xlu0 %268 }
 0x392   :  { %v220_v56 = vmul.f32 %v586_v4, %v214_v54  ;;  %v275_v8 = vmul.f32 %v617_v21, %v269_v6  ;;  %v378_v21 = vld [vmem:[%s676_s5] sm:$0xff] }
 0x395   :  { %v223_v55 = vpop.permute.xlu1 %222 }
 0x396   :  { %v229_v57 = vmul.f32 %v598_v10, %v223_v55 }
 0x398   :  { %v477_v58 = vpack.c.bf16 %v229_v57, %v220_v56 }
 0x399   :  { %v232_v59 = vpop.permute.xlu1 %231 }
 0x39a   :  { %478 = vmatpush3.bf16.msra.mxu1 %v477_v58  ;;  %v238_v61 = vmul.f32 %v581_v3, %v232_v59 }
 0x39b   :  { %479 = vmatprep.subr.bf16.mxu1 %v508_v1 }
 0x39d   :  { %v241_v60 = vpop.permute.xlu1 %240 }
 0x39e   :  { %v247_v62 = vmul.f32 %v593_v9, %v241_v60 }
 0x3a0   :  { %v480_v63 = vpack.c.bf16 %v247_v62, %v238_v61 }
 0x3a1   :  { %v251_v0 = vpop.permute.xlu1 %250 }
 0x3a2   :  { %v257_v5 = vmul.f32 %v605_v15, %v251_v0  ;;  %481 = vmatpush3.bf16.msra.mxu1 %v480_v63 }
 0x3a3   :  { %482 = vmatprep.subr.bf16.mxu1 %v508_v1 }
 0x3a4   :  { %v483_v4 = vpack.c.bf16 %v257_v5, %v212_v53 }
 0x3a5   :  { %v260_v7 = vpop.permute.xlu1 %259 }
 0x3a6   :  { %v266_v10 = vmul.f32 %v610_v16, %v260_v7  ;;  %484 = vmatpush3.bf16.msra.mxu1 %v483_v4 }
 0x3a7   :  { %485 = vmatprep.subr.bf16.mxu1 %v508_v1 }
 0x3a8   :  { %v486_v3 = vpack.c.bf16 %v275_v8, %v266_v10 }
 0x3a9   :  { %v278_v11 = vpop.permute.xlu1 %277 }
 0x3aa   :  { %487 = vmatpush3.bf16.msra.mxu1 %v486_v3  ;;  %v284_v9 = vmul.f32 %v622_v22, %v278_v11 }
 0x3ab   :  { %465 = vmatprep.subr.mxu1 %v516_v2  ;;  %v388_v2 = vld [vmem:[%s675_s6] sm:$0xff] }
 0x3ae   :  { %466 = vmatpush3.msra.mxu1 %v284_v9 }
 0x3af   :  { %468 = vmatmul.mubr.msk.f32.vlgmr.msra.gmra.mrb[0].mxu1 %vm296_vm3, %v286_v12 }
 0x482   :  { %v366_v13 = vpop.f32.mrb[0].mxu1 }
 0x483   :  { %370 = vadd.xlane.f32.xlu0 %v366_v13  ;;  %v469_v14 = vpop.f32.mrb[1].mxu1 }
 0x510   :  { %v371_v15 = vpop.xlane.xlu0 %370 }
 0x511   :  { %v372_v16 = vmul.f32 0.0078125, %v371_v15 }
 0x513   :  { %v373_v1 = vsub.f32 %v366_v13, %v372_v16 }
 0x515   :  { %v374_v17 = vmul.f32 %v373_v1, %v373_v1 }
 0x517   :  { %375 = vadd.xlane.f32.xlu1 %v374_v17 }
 0x528   :  { %391 = vperm.xlu1 %501, %v388_v2  }
 0x5a4   :  { %v376_v18 = vpop.xlane.xlu1 %375 }
 0x5a5   :  { %v377_v19 = vmul.f32 0.0078125, %v376_v18 }
 0x5a7   :  { %v379_v20 = vadd.f32 1e-05, %v377_v19 }
 0x5a8   :  { %v392_v26 = vpop.permute.xlu1 %391 }
 0x5a9   :  { %504 = vrsqrt.f32 %v379_v20 }
 0x5b3   :  { %v505_v22 = vpop.eup %504 }
 0x5b4   :  { %v381_v23 = vmul.f32 %v505_v22, %v378_v21 }
 0x5b6   :  { %384 = vperm.xlu0 %500, %v381_v23  }
 0x635   :  { %v385_v24 = vpop.permute.xlu0 %384 }
 0x636   :  { %v387_v25 = vmul.f32 %v385_v24, %v373_v1 }
 0x638   :  { %v394_v27 = vadd.f32 %v392_v26, %v387_v25 }
 0x63a   :  { %v395_v28 = vmax.f32 %v394_v27, 0.0 }
 0x63c   :  { %396 = vst [vmem:[%s677_s8] sm:$0xff] %v395_v28 }

</bundles_post_ra>
